<compile_context>
chip_gen: v5e
topology: v5e:2x2
jax: 0.10.0
libtpu: 0.0.40
codegen_flags: <defaults>
</compile_context>

<pallas_src>
import math

import jax
import jax.numpy as jnp
from jax.experimental import pallas as pl
from jax.experimental.pallas import tpu as pltpu


def _make_film_gauss_kernel(exp_bf16: bool):
    def film_gauss_kernel(x_ref, w_ref, b_ref, a_ref, c_ref, o_ref):
        # x_ref: (tm, D_in)  row tile of the flattened (B*N, D_in) input
        # w_ref: (D_in, H)   shared weights, pre-transposed, pre-scaled by 1/sigma
        # b_ref: (1, H)      shared bias, pre-scaled by 1/sigma
        # a_ref: (tm, 1)     per-row FiLM scale  (a broadcast from the batch)
        # c_ref: (tm, 1)     per-row FiLM shift  (b broadcast from the batch)
        # o_ref: (tm, H)
        u = jnp.dot(x_ref[...], w_ref[...], preferred_element_type=jnp.float32)
        u = u + b_ref[...]                      # (tm,H) + (1,H) broadcast
        t = -0.5 * (u * u)                      # sigma already folded into w/b
        if exp_bf16:
            # v7x EUP-relief path: transcendental in bf16, FiLM math in f32.
            g = jnp.exp(t.astype(jnp.bfloat16)).astype(jnp.float32)
        else:
            g = jnp.exp(t)
        o_ref[...] = (g * a_ref[...] + c_ref[...]).astype(o_ref.dtype)

    return film_gauss_kernel


def film_layer_gauss(x, weight, bias, cond_weight, cond_bias, z, sigma=1.0,
                     *, tm=1024, out_dtype=jnp.float32, exp_bf16=False):
    """x: (B,N,D_in); weight: (H,D_in); bias: (H,);
       cond_weight: (2,z_dim); cond_bias: (2,); z: (B,z_dim)."""
    B, N, D_in = x.shape
    H = weight.shape[0]
    M = B * N

    # Tiny cond_layer (z_dim -> 2) in plain JAX; broadcast its per-batch (a, b)
    # to per-row (M, 1) vectors (4 B/row each -- negligible next to x and out).
    ab = (jnp.dot(z.astype(jnp.float32), cond_weight.T.astype(jnp.float32))
          + cond_bias.astype(jnp.float32))                       # (B, 2)
    a_rows = jnp.repeat(ab[:, 0], N).reshape(M, 1)                # (M, 1)
    c_rows = jnp.repeat(ab[:, 1], N).reshape(M, 1)                # (M, 1)

    # Fold 1/sigma into the linear so the kernel never divides per element.
    inv_sigma = jnp.float32(1.0 / float(sigma))
    w_t = (weight.astype(jnp.float32).T * inv_sigma)              # (D_in, H)
    b_s = (bias.astype(jnp.float32) * inv_sigma).reshape(1, H)    # (1, H)

    # bf16 MXU inputs only when x already arrives in bf16 (avoids a separate
    # wrapper cast pass, which would be a net loss on a mem-bound kernel).
    x_mm = x.reshape(M, D_in)                                     # free reshape
    if x.dtype == jnp.bfloat16:
        w_mm = w_t.astype(jnp.bfloat16)
    else:
        x_mm = x_mm.astype(jnp.float32)
        w_mm = w_t
    out_dtype = jnp.dtype(out_dtype)

    # Row tile: multiple of 256 (MXU M passes on v6e/v7x) or the full extent.
    tm = int(tm)
    if tm >= M:
        tm = M
    else:
        tm = min(max(256, (tm // 256) * 256), M)
    grid = (pl.cdiv(M, tm),)

    # Estimated per-step VMEM working set (double-buffered streams + constant
    # weight/bias single-buffered); raise the scoped-VMEM limit only if needed.
    vmem_bytes = (2 * tm * D_in * x_mm.dtype.itemsize          # x tiles
                  + 2 * tm * H * out_dtype.itemsize            # out tiles
                  + 2 * 2 * tm * 4                             # a/c tiles
                  + (D_in + 1) * H * w_mm.dtype.itemsize)      # weights + bias
    cp_kwargs = dict(dimension_semantics=("parallel",))
    if vmem_bytes > 24 * 1024 * 1024:
        cp_kwargs["vmem_limit_bytes"] = min(int(vmem_bytes * 3 // 2), 64 << 20)

    out = pl.pallas_call(
        _make_film_gauss_kernel(exp_bf16),
        out_shape=jax.ShapeDtypeStruct((M, H), out_dtype),
        grid=grid,
        in_specs=[
            # Streaming row tile of x.
            pl.BlockSpec((tm, D_in), lambda i: (i, 0)),
            # Constant weight/bias blocks: same block every step -> single
            # buffer is enough (halves the VMEM they hold).
            pl.BlockSpec((D_in, H), lambda i: (0, 0),
                         pipeline_mode=pl.Buffered(1)),
            pl.BlockSpec((1, H), lambda i: (0, 0),
                         pipeline_mode=pl.Buffered(1)),
            # Per-row FiLM scale / shift.
            pl.BlockSpec((tm, 1), lambda i: (i, 0)),
            pl.BlockSpec((tm, 1), lambda i: (i, 0)),
        ],
        out_specs=pl.BlockSpec((tm, H), lambda i: (i, 0)),
        compiler_params=pltpu.CompilerParams(**cp_kwargs),
    )(x_mm, w_mm, b_s, a_rows, c_rows)

    return out.reshape(B, N, H)


def film_gauss_ref(x, weight, bias, cond_weight, cond_bias, z, sigma):
    h = jnp.einsum("bnd,hd->bnh", x, weight) + bias
    g = jnp.exp(-0.5 * jnp.square(h / sigma))
    y = jnp.dot(z, cond_weight.T) + cond_bias
    a = y[:, 0][:, None, None]
    b = y[:, 1][:, None, None]
    return g * a + b


if __name__ == "__main__":
    B, N, D_IN, H, Z_DIM = 2, 256, 32, 128, 100
    SIGMA = 0.75

    key = jax.random.PRNGKey(0)
    kx, kz, kw, kb, kcw, kcb = jax.random.split(key, 6)

    # Deterministic nn.Linear-style init: U(-1/sqrt(fan_in), 1/sqrt(fan_in))
    bound = 1.0 / math.sqrt(D_IN)
    weight = jax.random.uniform(kw, (H, D_IN), jnp.float32, -bound, bound)
    bias = jax.random.uniform(kb, (H,), jnp.float32, -bound, bound)
    cbound = 1.0 / math.sqrt(Z_DIM)
    cond_weight = jax.random.uniform(kcw, (2, Z_DIM), jnp.float32, -cbound, cbound)
    cond_bias = jax.random.uniform(kcb, (2,), jnp.float32, -cbound, cbound)

    x = jax.random.normal(kx, (B, N, D_IN), jnp.float32)
    z = jax.random.normal(kz, (B, Z_DIM), jnp.float32)

    out = film_layer_gauss(x, weight, bias, cond_weight, cond_bias, z, SIGMA,
                           tm=256)   # 512 rows -> 2 grid steps in the demo
    out = jax.block_until_ready(out)

    ref = film_gauss_ref(x, weight, bias, cond_weight, cond_bias, z, SIGMA)
    assert out.shape == (B, N, H)
    assert jnp.allclose(out, ref, atol=1e-4, rtol=1e-4), "mismatch vs reference"

    print("KERNEL_OK")
</pallas_src>

<mosaic_0001>
module attributes {stable_mosaic.version = 11 : i64} {
  func.func @film_gauss_kernel(%arg0: i32, %arg1: memref<256x32xf32, #tpu.memory_space<vmem>>, %arg2: memref<32x128xf32, #tpu.memory_space<vmem>>, %arg3: memref<1x128xf32, #tpu.memory_space<vmem>>, %arg4: memref<256x1xf32, #tpu.memory_space<vmem>>, %arg5: memref<256x1xf32, #tpu.memory_space<vmem>>, %arg6: memref<256x128xf32, #tpu.memory_space<vmem>>) attributes {dimension_semantics = [#tpu.dimension_semantics<parallel>], iteration_bounds = array<i64: 2>, scalar_prefetch = 0 : i64, scratch_operands = 0 : i64, tpu.core_type = #tpu.core_type<tc>, window_params = [{transform_indices = @transform_0, window_bounds = array<i64: 256, 32>}, {pipeline_mode = #tpu.pipeline_mode<synchronous>, transform_indices = @transform_1, window_bounds = array<i64: 32, 128>}, {pipeline_mode = #tpu.pipeline_mode<synchronous>, transform_indices = @transform_2, window_bounds = array<i64: 1, 128>}, {transform_indices = @transform_3, window_bounds = array<i64: 256, 1>}, {transform_indices = @transform_4, window_bounds = array<i64: 256, 1>}, {transform_indices = @transform_5, window_bounds = array<i64: 256, 128>}]} {
    %c0 = arith.constant 0 : index
    %c0_0 = arith.constant 0 : index
    %0 = vector.load %arg1[%c0, %c0_0] : memref<256x32xf32, #tpu.memory_space<vmem>>, vector<256x32xf32>
    %c0_1 = arith.constant 0 : index
    %c0_2 = arith.constant 0 : index
    %1 = vector.load %arg2[%c0_1, %c0_2] : memref<32x128xf32, #tpu.memory_space<vmem>>, vector<32x128xf32>
    %cst = arith.constant dense<0.000000e+00> : vector<256x128xf32>
    %2 = tpu.matmul %0, %1, %cst {dimension_numbers = #tpu.dot_dimension_numbers<[1], [0], [0], [1], [0, 0, 1, 1], [], []>} : vector<256x32xf32>, vector<32x128xf32>, vector<256x128xf32> -> vector<256x128xf32>
    %c0_3 = arith.constant 0 : index
    %c0_4 = arith.constant 0 : index
    %3 = vector.load %arg3[%c0_3, %c0_4] : memref<1x128xf32, #tpu.memory_space<vmem>>, vector<1x128xf32>
    %4 = vector.broadcast %3 : vector<1x128xf32> to vector<256x128xf32>
    %5 = arith.addf %2, %4 : vector<256x128xf32>
    %6 = arith.mulf %5, %5 : vector<256x128xf32>
    %cst_5 = arith.constant -5.000000e-01 : f32
    %7 = vector.broadcast %cst_5 : f32 to vector<256x128xf32>
    %8 = arith.mulf %7, %6 : vector<256x128xf32>
    %9 = math.exp %8 : vector<256x128xf32>
    %c0_6 = arith.constant 0 : index
    %c0_7 = arith.constant 0 : index
    %10 = vector.load %arg4[%c0_6, %c0_7] : memref<256x1xf32, #tpu.memory_space<vmem>>, vector<256x1xf32>
    %11 = vector.broadcast %10 : vector<256x1xf32> to vector<256x128xf32>
    %12 = arith.mulf %9, %11 : vector<256x128xf32>
    %c0_8 = arith.constant 0 : index
    %c0_9 = arith.constant 0 : index
    %13 = vector.load %arg5[%c0_8, %c0_9] : memref<256x1xf32, #tpu.memory_space<vmem>>, vector<256x1xf32>
    %14 = vector.broadcast %13 : vector<256x1xf32> to vector<256x128xf32>
    %15 = arith.addf %12, %14 : vector<256x128xf32>
    %c0_10 = arith.constant 0 : index
    %c0_11 = arith.constant 0 : index
    %16 = vector.load %arg6[%c0_10, %c0_11] : memref<256x128xf32, #tpu.memory_space<vmem>>, vector<256x128xf32>
    tpu.vector_store %arg6[%c0_10, %c0_11], %15 {strides = array<i32>} : memref<256x128xf32, #tpu.memory_space<vmem>>, vector<256x128xf32>,
    return
  }
  func.func @transform_0(%arg0: i32) -> (i32, i32) {
    %c0_i32 = arith.constant 0 : i32
    %c0_i32_0 = arith.constant 0 : i32
    return %arg0, %c0_i32 : i32, i32
  }
  func.func @transform_1(%arg0: i32) -> (i32, i32) {
    %c0_i32 = arith.constant 0 : i32
    %c0_i32_0 = arith.constant 0 : i32
    %c0_i32_1 = arith.constant 0 : i32
    return %c0_i32, %c0_i32_0 : i32, i32
  }
  func.func @transform_2(%arg0: i32) -> (i32, i32) {
    %c0_i32 = arith.constant 0 : i32
    %c0_i32_0 = arith.constant 0 : i32
    %c0_i32_1 = arith.constant 0 : i32
    return %c0_i32, %c0_i32_0 : i32, i32
  }
  func.func @transform_3(%arg0: i32) -> (i32, i32) {
    %c0_i32 = arith.constant 0 : i32
    %c0_i32_0 = arith.constant 0 : i32
    return %arg0, %c0_i32 : i32, i32
  }
  func.func @transform_4(%arg0: i32) -> (i32, i32) {
    %c0_i32 = arith.constant 0 : i32
    %c0_i32_0 = arith.constant 0 : i32
    return %arg0, %c0_i32 : i32, i32
  }
  func.func @transform_5(%arg0: i32) -> (i32, i32) {
    %c0_i32 = arith.constant 0 : i32
    %c0_i32_0 = arith.constant 0 : i32
    return %arg0, %c0_i32 : i32, i32
  }
}

</mosaic_0001>

<bundles_post_ra>
// kernel: tpu_custom_call.1
= control target key start
LH: loop header
LB: loop body
LE: loop exit
PB: predicated region body
PF: predicated region fallthrough
CT: control target
= control target key end

     0   :  { %10 = vsyncpa [#allocation3], 0  ;;  %s1971_s0 = inlined_call_operand.vmem [shape: f32[512,32], index: 0, kind: input, shape index: {}]   ;;  %s1972_s1 = inlined_call_operand.vmem [shape: f32[32,128], index: 1, kind: input, shape index: {}]   ;;  %s1973_s2 = inlined_call_operand.vmem [shape: f32[1,128], index: 2, kind: input, shape index: {}]   ;;  %s1974_s3 = inlined_call_operand.vmem [shape: f32[512,1], index: 3, kind: input, shape index: {}]   ;;  %s1975_s4 = inlined_call_operand.vmem [shape: f32[512,1], index: 4, kind: input, shape index: {}]   ;;  %s1976_s5 = inlined_call_operand.hbm [shape: f32[512,128], index: 5, kind: output, shape index: {}]  }
   0x1   :  { %12 = vsyncpa [#allocation3 + $0x1], 0  ;;  %s1498_s18 = smov 0   ;;  %s1500_s19 = smov 0  }
   0x2   :  { %s1502_s20 = smov 0   ;;  %s1504_s21 = smov 0  }
   0x3 LB: > { %s1519_s22 = sadd.s32 4294967295, %s1463_s21   ;;  %s1230_s23 = sadd.s32 4294967294, %s1463_s21   ;;  %s1463_s21 = sphi %s1504_s21, %s1982_s21   ;;  %s1459_s20 = sphi %s1502_s20, %s1981_s20   ;;  %s1455_s19 = sphi %s1500_s19, %s1980_s19   ;;  %s1451_s18 = sphi %s1498_s18, %s1979_s18  }
   0x4   : > { %s1523_s24 = sadd.s32 1, %s1463_s21   ;;  %s145_s25 = sadd.s32 1, %s1459_s20 }
   0x5   : > { %s142_s26 = ssub.s32 %s1463_s21, %s1523_s24  ;;  %p155_p0 = scmp.ne.s32.totalorder %s1459_s20, %s1455_s19 }
   0x6   : > { %p143_p1 = scmp.eq.s32.totalorder %s142_s26, 0  ;;  %p156_p2 = scmp.eq.s32.totalorder %s1519_s22, 1 }
   0x7   : > { %p161_p3 = scmp.ne.s32.totalorder %s1455_s19, %s1451_s18  ;;  %p162_p4 = scmp.eq.s32.totalorder %s1230_s23, 1 }
   0x8   : > { %s1534_s27 = scalar_select %p143_p1, %s1459_s20, %s145_s25  }
   0x9   : > { %p1536_p5 = por %p156_p2, %p155_p0  ;;  %p1540_p6 = por %p162_p4, %p161_p3 }
   0xa   : > { %p1233_p7 = scmp.ge.s32.totalorder %s1463_s21, 1  ;;  %p213_p8 = scmp.lt.s32.totalorder %s1463_s21, 3 }
   0xc   : > { %p214_p9 = pnand %p1233_p7, %p213_p8 }
   0xd   : > { %s1235_s9 = sshll.u32 (!%p214_p9), %s1519_s22, 5  ;;  %s248_s10 = sand.u32 (!%p214_p9), 1, %s1455_s19  }
   0xe   : > { %217 = sbr.rel (%p214_p9) target bundleno = 319 (0x13f), region = 40  ;;  %p252_p10 = scmp.lt.s32.totalorder (!%p214_p9), %s1235_s9, 63 }
   0xf   : > { %s1234_s11 = sshll.u32 (!%p214_p9), %s248_s10, 8  ;;  %s1278_s13 = sshll.u32 (!%p214_p9), %s1519_s22, 8 }
  0x10   : > { %s1807_s12 = scalar_lea.vmem (!%p214_p9), [#allocation2], %s1234_s11  ;;  %s1140_s16 = scalar_lea.hbm (!%p214_p9), %s1976_s5, %s1278_s13 }
  0x11   : > { %s1143_s23 = sshll.u32 (!%p214_p9), %s1140_s16, 4  ;;  %s1129_s22 = scalar_lea.sflag (!%p214_p9), [#allocation3], %s248_s10  ;;  %s1144_s23 = int_to_ptr.hbm [resolvable:$true] %s1143_s23 }
  0x12   : > { %s1415_s25 = sshra.s32 (!%p214_p9), %s1144_s23, 4  ;;  %s1416_s25 = int_to_ptr.hbm [resolvable:$true] %s1415_s25 }
  0x13   : > { %v305_v0 = vld [vmem:[%s1972_s1 + $0x18] sm:$0xff]  ;;  %v304_v1 = vld [vmem:[%s1972_s1 + $0x10] sm:$0xff]  ;;  %v303_v2 = vld [vmem:[%s1972_s1 + $0x8] sm:$0xff]  ;;  %s1984_s9 = smov (!%p252_p10, %s1235_s9), 63  ;;  %v1465_v4 = vmov 0   ;;  %vm310_vm0 = vcmask 261120   ;;  %p1422_p0 = scmp.lt.s32.totalorder %s1416_s25, %s1976_s5 }
  0x14   : > { %419 = vmatpush.msra.mxu0 %v305_v0  ;;  %1279 = vmatpush.msra.mxu1 %v305_v0  ;;  %v302_v3 = vld [vmem:[%s1972_s1] sm:$0xff]  ;;  %s1559_s14 = sshll.u32 %s1984_s9, 3 }
  0x15   : > { %1280 = vmatpush.msra.mxu2 %v305_v0  ;;  %1281 = vmatpush.msra.mxu3 %v305_v0  ;;  %s1565_s17 = scalar_lea.vmem %s1974_s3, %s1559_s14  ;;  %s1571_s26 = scalar_lea.vmem %s1971_s0, %s1559_s14 }
  0x16   : > { %420 = vmatpush.msra.mxu0 %v304_v1  ;;  %1282 = vmatpush.msra.mxu1 %v304_v1  ;;  %v652_v5 = vld [vmem:[%s1565_s17 + $0x20] sm:$0xff]  ;;  %v650_v6 = vld [vmem:[%s1565_s17 + $0x10] sm:$0xff]  ;;  %v653_v12 = vld [vmem:[%s1565_s17 + $0x28] sm:$0xff]  ;;  %s1671_s7 = scalar_lea.vmem %s1975_s4, %s1559_s14 }
  0x17   : > { %1283 = vmatpush.msra.mxu2 %v304_v1  ;;  %1284 = vmatpush.msra.mxu3 %v304_v1  ;;  %v648_v7 = vld [vmem:[%s1565_s17] sm:$0xff]  ;;  %v651_v13 = vld [vmem:[%s1565_s17 + $0x18] sm:$0xff]  ;;  %v649_v14 = vld [vmem:[%s1565_s17 + $0x8] sm:$0xff] }
  0x18   : > { %421 = vmatpush.msra.mxu0 %v303_v2  ;;  %1285 = vmatpush.msra.mxu1 %v303_v2  ;;  %v270_v8 = vld [vmem:[%s1571_s26] sm:$0xff]  ;;  %v271_v15 = vld [vmem:[%s1571_s26 + $0x8] sm:$0xff]  ;;  %v655_v20 = vld [vmem:[%s1565_s17 + $0x38] sm:$0xff] }
  0x19   : > { %1286 = vmatpush.msra.mxu2 %v303_v2  ;;  %1287 = vmatpush.msra.mxu3 %v303_v2  ;;  %v278_v9 = vld [vmem:[%s1571_s26 + $0x40] sm:$0xff]  ;;  %v279_v16 = vld [vmem:[%s1571_s26 + $0x48] sm:$0xff]  ;;  %v654_v21 = vld [vmem:[%s1565_s17 + $0x30] sm:$0xff] }
  0x1a   : > { %1335 = vset.pattern.permute.xlu2 %v1465_v4  ;;  %1334 = vset.pattern.permute.xlu1 %v1465_v4  ;;  %v286_v10 = vld [vmem:[%s1571_s26 + $0x80] sm:$0xff]  ;;  %v287_v17 = vld [vmem:[%s1571_s26 + $0x88] sm:$0xff]  ;;  %v272_v22 = vld [vmem:[%s1571_s26 + $0x10] sm:$0xff] }
  0x1b   : > { %1333 = vset.pattern.permute.xlu0 %v1465_v4  ;;  %422 = vmatpush.msra.mxu0 %v302_v3  ;;  %v294_v11 = vld [vmem:[%s1571_s26 + $0xc0] sm:$0xff]  ;;  %v295_v18 = vld [vmem:[%s1571_s26 + $0xc8] sm:$0xff]  ;;  %v280_v23 = vld [vmem:[%s1571_s26 + $0x50] sm:$0xff] }
  0x1c   : > { %1288 = vmatpush.msra.mxu1 %v302_v3  ;;  %1289 = vmatpush.msra.mxu2 %v302_v3  ;;  %v656_v19 = vld [vmem:[%s1565_s17 + $0x40] sm:$0xff]  ;;  %v288_v24 = vld [vmem:[%s1571_s26 + $0x90] sm:$0xff]  ;;  %v659_v26 = vld [vmem:[%s1565_s17 + $0x58] sm:$0xff] }
  0x1d   : > { %1290 = vmatpush.msra.mxu3 %v302_v3  ;;  %702 = vperm.xlu2 %1335, %v652_v5   ;;  %v296_v25 = vld [vmem:[%s1571_s26 + $0xd0] sm:$0xff]  ;;  %v657_v28 = vld [vmem:[%s1565_s17 + $0x48] sm:$0xff]  ;;  %v273_v29 = vld [vmem:[%s1571_s26 + $0x18] sm:$0xff] }
  0x1e   : > { %692 = vperm.xlu1 %1334, %v650_v6   ;;  %682 = vperm.xlu0 %1333, %v648_v7   ;;  %v658_v27 = vld [vmem:[%s1565_s17 + $0x50] sm:$0xff]  ;;  %v281_v30 = vld [vmem:[%s1571_s26 + $0x58] sm:$0xff]  ;;  %v661_v34 = vld [vmem:[%s1565_s17 + $0x68] sm:$0xff] }
  0x1f   : > { %1241 = vmatmul.msk.f32.vlgmr.msra.gmra.mxu0 %vm310_vm0, %v270_v8  ;;  %1249 = vmatmul.msk.f32.vlgmr.msra.gmra.mxu1 %vm310_vm0, %v278_v9  ;;  %v289_v31 = vld [vmem:[%s1571_s26 + $0x98] sm:$0xff]  ;;  %v662_v33 = vld [vmem:[%s1565_s17 + $0x70] sm:$0xff]  ;;  %v660_v35 = vld [vmem:[%s1565_s17 + $0x60] sm:$0xff] }
  0x20   : > { %1257 = vmatmul.msk.f32.vlgmr.msra.gmra.mxu2 %vm310_vm0, %v286_v10  ;;  %1265 = vmatmul.msk.f32.vlgmr.msra.gmra.mxu3 %vm310_vm0, %v294_v11  ;;  %v297_v32 = vld [vmem:[%s1571_s26 + $0xd8] sm:$0xff]  ;;  %v274_v36 = vld [vmem:[%s1571_s26 + $0x20] sm:$0xff]  ;;  %v665_v40 = vld [vmem:[%s1565_s17 + $0x88] sm:$0xff] }
  0x21   : > { %v282_v37 = vld [vmem:[%s1571_s26 + $0x60] sm:$0xff]  ;;  %v663_v42 = vld [vmem:[%s1565_s17 + $0x78] sm:$0xff]  ;;  %v275_v43 = vld [vmem:[%s1571_s26 + $0x28] sm:$0xff] }
  0x22   : > { %v290_v38 = vld [vmem:[%s1571_s26 + $0xa0] sm:$0xff]  ;;  %v283_v44 = vld [vmem:[%s1571_s26 + $0x68] sm:$0xff]  ;;  %v667_v48 = vld [vmem:[%s1565_s17 + $0x98] sm:$0xff] }
  0x23   : > { %v298_v39 = vld [vmem:[%s1571_s26 + $0xe0] sm:$0xff]  ;;  %v291_v45 = vld [vmem:[%s1571_s26 + $0xa8] sm:$0xff]  ;;  %v666_v49 = vld [vmem:[%s1565_s17 + $0x90] sm:$0xff] }
  0x24   : > { %v664_v41 = vld [vmem:[%s1565_s17 + $0x80] sm:$0xff]  ;;  %v299_v46 = vld [vmem:[%s1571_s26 + $0xe8] sm:$0xff]  ;;  %v276_v50 = vld [vmem:[%s1571_s26 + $0x30] sm:$0xff] }
  0x25   : > { %707 = vperm.xlu2 %1335, %v653_v12   ;;  %v668_v47 = vld [vmem:[%s1565_s17 + $0xa0] sm:$0xff]  ;;  %v284_v51 = vld [vmem:[%s1571_s26 + $0x70] sm:$0xff]  ;;  %v671_v54 = vld [vmem:[%s1565_s17 + $0xb8] sm:$0xff] }
  0x26   : > { %697 = vperm.xlu1 %1334, %v651_v13   ;;  %687 = vperm.xlu0 %1333, %v649_v14   ;;  %v292_v52 = vld [vmem:[%s1571_s26 + $0xb0] sm:$0xff]  ;;  %v669_v56 = vld [vmem:[%s1565_s17 + $0xa8] sm:$0xff]  ;;  %v277_v57 = vld [vmem:[%s1571_s26 + $0x38] sm:$0xff] }
  0x27   : > { %1242 = vmatmul.msk.f32.gmra.mxu0 %vm310_vm0, %v271_v15  ;;  %1250 = vmatmul.msk.f32.gmra.mxu1 %vm310_vm0, %v279_v16  ;;  %v300_v53 = vld [vmem:[%s1571_s26 + $0xf0] sm:$0xff]  ;;  %v285_v58 = vld [vmem:[%s1571_s26 + $0x78] sm:$0xff]  ;;  %v673_v62 = vld [vmem:[%s1565_s17 + $0xc8] sm:$0xff] }
  0x28   : > { %1258 = vmatmul.msk.f32.gmra.mxu2 %vm310_vm0, %v287_v17  ;;  %1266 = vmatmul.msk.f32.gmra.mxu3 %vm310_vm0, %v295_v18  ;;  %v670_v55 = vld [vmem:[%s1565_s17 + $0xb0] sm:$0xff]  ;;  %v293_v59 = vld [vmem:[%s1571_s26 + $0xb8] sm:$0xff]  ;;  %v672_v63 = vld [vmem:[%s1565_s17 + $0xc0] sm:$0xff] }
  0x29   : > { %v301_v60 = vld [vmem:[%s1571_s26 + $0xf8] sm:$0xff]  ;;  %v674_v61 = vld [vmem:[%s1565_s17 + $0xd0] sm:$0xff]  ;;  %v677_v0 = vld [vmem:[%s1565_s17 + $0xe8] sm:$0xff]  ;;  %s1417_s26 = scalar_lea.hbm %s1416_s25, 256 }
  0x2a   : > { %v676_v1 = vld [vmem:[%s1565_s17 + $0xe0] sm:$0xff]  ;;  %v675_v2 = vld [vmem:[%s1565_s17 + $0xd8] sm:$0xff]  ;;  %v678_v5 = vld [vmem:[%s1565_s17 + $0xf0] sm:$0xff]  ;;  %p1418_p11 = scmp.ne.s32.totalorder %s1416_s25, %s1417_s26 }
  0x2b   : > { %v872_v3 = vld [vmem:[%s1671_s7] sm:$0xff]  ;;  %v679_v4 = vld [vmem:[%s1565_s17 + $0xf8] sm:$0xff]  ;;  %v874_v7 = vld [vmem:[%s1671_s7 + $0x10] sm:$0xff]  ;;  %s1141_s17 = sshll.u32 %s1807_s12, 4  ;;  %s1142_s17 = int_to_ptr.vmem [resolvable:$true] %s1141_s17 }
  0x2c   : > { %v875_v6 = vld [vmem:[%s1671_s7 + $0x18] sm:$0xff]  ;;  %v873_v8 = vld [vmem:[%s1671_s7 + $0x8] sm:$0xff]  ;;  %v878_v10 = vld [vmem:[%s1671_s7 + $0x30] sm:$0xff]  ;;  %p1419_p12 = pnand %p1418_p11, %p1536_p5 }
  0x2d   : > { %722 = vperm.xlu2 %1335, %v656_v19   ;;  %v877_v11 = vld [vmem:[%s1671_s7 + $0x28] sm:$0xff]  ;;  %v876_v12 = vld [vmem:[%s1671_s7 + $0x20] sm:$0xff]  ;;  %v879_v16 = vld [vmem:[%s1671_s7 + $0x38] sm:$0xff] }
  0x2e   : > { %717 = vperm.xlu1 %1334, %v655_v20   ;;  %712 = vperm.xlu0 %1333, %v654_v21   ;;  %v881_v14 = vld [vmem:[%s1671_s7 + $0x48] sm:$0xff]  ;;  %v880_v15 = vld [vmem:[%s1671_s7 + $0x40] sm:$0xff]  ;;  %v883_v19 = vld [vmem:[%s1671_s7 + $0x58] sm:$0xff]  ;;  %p1420_p13 = pneg %p1419_p12 }
  0x2f   : > { %1243 = vmatmul.msk.f32.gmra.mxu0 %vm310_vm0, %v272_v22  ;;  %1251 = vmatmul.msk.f32.gmra.mxu1 %vm310_vm0, %v280_v23  ;;  %v884_v18 = vld [vmem:[%s1671_s7 + $0x60] sm:$0xff]  ;;  %v882_v20 = vld [vmem:[%s1671_s7 + $0x50] sm:$0xff] }
  0x30   : > { %1259 = vmatmul.msk.f32.gmra.mxu2 %vm310_vm0, %v288_v24  ;;  %1267 = vmatmul.msk.f32.gmra.mxu3 %vm310_vm0, %v296_v25  ;;  %v887_v24 = vld [vmem:[%s1671_s7 + $0x78] sm:$0xff]  ;;  %v886_v25 = vld [vmem:[%s1671_s7 + $0x70] sm:$0xff] }
  0x35   : > { %737 = vperm.xlu2 %1335, %v659_v26   ;;  %v885_v26 = vld [vmem:[%s1671_s7 + $0x68] sm:$0xff] }
  0x36   : > { %732 = vperm.xlu1 %1334, %v658_v27   ;;  %727 = vperm.xlu0 %1333, %v657_v28  }
  0x37   : > { %1244 = vmatmul.msk.f32.gmra.mxu0 %vm310_vm0, %v273_v29  ;;  %1252 = vmatmul.msk.f32.gmra.mxu1 %vm310_vm0, %v281_v30  ;;  %v1712_v30 = vld [vmem:[%s1973_s2] ss:$0 sm:$0xff] }
  0x38   : > { %1260 = vmatmul.msk.f32.gmra.mxu2 %vm310_vm0, %v289_v31  ;;  %1268 = vmatmul.msk.f32.gmra.mxu3 %vm310_vm0, %v297_v32  ;;  %v890_v31 = vld [vmem:[%s1671_s7 + $0x90] sm:$0xff]  ;;  %v889_v32 = vld [vmem:[%s1671_s7 + $0x88] sm:$0xff] }
  0x3d   : > { %752 = vperm.xlu2 %1335, %v662_v33   ;;  %v888_v33 = vld [vmem:[%s1671_s7 + $0x80] sm:$0xff] }
  0x3e   : > { %747 = vperm.xlu1 %1334, %v661_v34   ;;  %742 = vperm.xlu0 %1333, %v660_v35  }
  0x3f   : > { %1245 = vmatmul.msk.f32.gmra.mxu0 %vm310_vm0, %v274_v36  ;;  %1253 = vmatmul.msk.f32.gmra.mxu1 %vm310_vm0, %v282_v37 }
  0x40   : > { %1261 = vmatmul.msk.f32.gmra.mxu2 %vm310_vm0, %v290_v38  ;;  %1269 = vmatmul.msk.f32.gmra.mxu3 %vm310_vm0, %v298_v39 }
  0x45   : > { %767 = vperm.xlu2 %1335, %v665_v40  }
  0x46   : > { %762 = vperm.xlu1 %1334, %v664_v41   ;;  %757 = vperm.xlu0 %1333, %v663_v42   ;;  %v893_v42 = vld [vmem:[%s1671_s7 + $0xa8] sm:$0xff] }
  0x47   : > { %1246 = vmatmul.msk.f32.gmra.mxu0 %vm310_vm0, %v275_v43  ;;  %1254 = vmatmul.msk.f32.gmra.mxu1 %vm310_vm0, %v283_v44 }
  0x48   : > { %1262 = vmatmul.msk.f32.gmra.mxu2 %vm310_vm0, %v291_v45  ;;  %1270 = vmatmul.msk.f32.gmra.mxu3 %vm310_vm0, %v299_v46  ;;  %v892_v46 = vld [vmem:[%s1671_s7 + $0xa0] sm:$0xff] }
  0x4d   : > { %782 = vperm.xlu2 %1335, %v668_v47   ;;  %v891_v47 = vld [vmem:[%s1671_s7 + $0x98] sm:$0xff] }
  0x4e   : > { %777 = vperm.xlu1 %1334, %v667_v48   ;;  %772 = vperm.xlu0 %1333, %v666_v49  }
  0x4f   : > { %1247 = vmatmul.msk.f32.gmra.mxu0 %vm310_vm0, %v276_v50  ;;  %1255 = vmatmul.msk.f32.gmra.mxu1 %vm310_vm0, %v284_v51 }
  0x50   : > { %1263 = vmatmul.msk.f32.gmra.mxu2 %vm310_vm0, %v292_v52  ;;  %1271 = vmatmul.msk.f32.gmra.mxu3 %vm310_vm0, %v300_v53 }
  0x55   : > { %797 = vperm.xlu2 %1335, %v671_v54  }
  0x56   : > { %792 = vperm.xlu1 %1334, %v670_v55   ;;  %787 = vperm.xlu0 %1333, %v669_v56   ;;  %v896_v56 = vld [vmem:[%s1671_s7 + $0xc0] sm:$0xff] }
  0x57   : > { %1248 = vmatmul.msk.f32.gmra.mxu0 %vm310_vm0, %v277_v57  ;;  %1256 = vmatmul.msk.f32.gmra.mxu1 %vm310_vm0, %v285_v58 }
  0x58   : > { %1264 = vmatmul.msk.f32.gmra.mxu2 %vm310_vm0, %v293_v59  ;;  %1272 = vmatmul.msk.f32.gmra.mxu3 %vm310_vm0, %v301_v60  ;;  %v895_v59 = vld [vmem:[%s1671_s7 + $0xb8] sm:$0xff]  ;;  %v894_v60 = vld [vmem:[%s1671_s7 + $0xb0] sm:$0xff] }
  0x5d   : > { %812 = vperm.xlu2 %1335, %v674_v61  }
  0x5e   : > { %807 = vperm.xlu1 %1334, %v673_v62   ;;  %802 = vperm.xlu0 %1333, %v672_v63  }
  0x65   : > { %827 = vperm.xlu2 %1335, %v677_v0  }
  0x66   : > { %822 = vperm.xlu1 %1334, %v676_v1   ;;  %817 = vperm.xlu0 %1333, %v675_v2  }
  0x6d   : > { %906 = vperm.xlu2 %1335, %v872_v3  }
  0x6e   : > { %837 = vperm.xlu1 %1334, %v679_v4   ;;  %832 = vperm.xlu0 %1333, %v678_v5  }
  0x75   : > { %921 = vperm.xlu2 %1335, %v875_v6  }
  0x76   : > { %916 = vperm.xlu1 %1334, %v874_v7   ;;  %911 = vperm.xlu0 %1333, %v873_v8  }
  0x77   : > { %v1679_v9 = vpop.permute.xlu2 %702 }
  0x7d   : > { %936 = vperm.xlu2 %1335, %v878_v10  }
  0x7e   : > { %931 = vperm.xlu1 %1334, %v877_v11   ;;  %926 = vperm.xlu0 %1333, %v876_v12   ;;  %v899_v12 = vld [vmem:[%s1671_s7 + $0xd8] sm:$0xff] }
  0x7f   : > { %v1684_v13 = vpop.permute.xlu2 %707 }
  0x85   : > { %951 = vperm.xlu2 %1335, %v881_v14  }
  0x86   : > { %946 = vperm.xlu1 %1334, %v880_v15   ;;  %941 = vperm.xlu0 %1333, %v879_v16   ;;  %v898_v16 = vld [vmem:[%s1671_s7 + $0xd0] sm:$0xff] }
  0x87   : > { %v1689_v17 = vpop.permute.xlu2 %722 }
  0x8d   : > { %966 = vperm.xlu2 %1335, %v884_v18  }
  0x8e   : > { %961 = vperm.xlu1 %1334, %v883_v19   ;;  %956 = vperm.xlu0 %1333, %v882_v20  }
  0x8f   : > { %v1694_v21 = vpop.permute.xlu2 %737 }
  0x90   : > { %v1696_v22 = vpop.permute.xlu1 %692  ;;  %v1698_v23 = vpop.permute.xlu0 %682 }
  0x95   : > { %981 = vperm.xlu2 %1335, %v887_v24  }
  0x96   : > { %976 = vperm.xlu1 %1334, %v886_v25   ;;  %971 = vperm.xlu0 %1333, %v885_v26  }
  0x97   : > { %v1703_v27 = vpop.permute.xlu2 %752 }
  0x98   : > { %v1705_v28 = vpop.permute.xlu1 %697  ;;  %v1707_v29 = vpop.permute.xlu0 %687 }
  0x9c   : > { %v424_v34 = vpop.f32.mrf.mxu0  ;;  %v448_v35 = vpop.f32.mrf.mxu1 }
  0x9d   : > { %v449_v36 = vadd.f32 %v1712_v30, %v448_v35  ;;  %996 = vperm.xlu2 %1335, %v890_v31   ;;  %v425_v62 = vadd.f32 %v1712_v30, %v424_v34 }
  0x9e   : > { %991 = vperm.xlu1 %1334, %v889_v32   ;;  %986 = vperm.xlu0 %1333, %v888_v33  }
  0x9f   : > { %v528_v37 = vmul.f32 %v449_v36, %v449_v36  ;;  %v1718_v38 = vpop.permute.xlu2 %767  ;;  %v520_v6 = vmul.f32 %v425_v62, %v425_v62 }
  0xa0   : > { %v1720_v39 = vpop.permute.xlu1 %717  ;;  %v1722_v40 = vpop.permute.xlu0 %712 }
  0xa1   : > { %v560_v41 = vmul.f32 -0.5, %v528_v37  ;;  %v552_v18 = vmul.f32 -0.5, %v520_v6 }
  0xa3   : > { %v600_v43 = vmul.f32 1.442695, %v560_v41  ;;  %v472_v44 = vpop.f32.mrf.mxu2  ;;  %v1725_v45 = vpop.f32.mrf.mxu3  ;;  %v584_v34 = vmul.f32 1.442695, %v552_v18 }
  0xa4   : > { %v473_v48 = vadd.f32 %v1712_v30, %v472_v44  ;;  %v1730_v49 = vpop.f32.mrf.mxu0  ;;  %v1732_v50 = vpop.f32.mrf.mxu1 }
  0xa5   : > { %1011 = vperm.xlu2 %1335, %v893_v42   ;;  %1337 = vpow2.f32 %v600_v43 }
  0xa6   : > { %v536_v51 = vmul.f32 %v473_v48, %v473_v48  ;;  %1006 = vperm.xlu1 %1334, %v892_v46   ;;  %1001 = vperm.xlu0 %1333, %v891_v47   ;;  %v902_v46 = vld [vmem:[%s1671_s7 + $0xf0] sm:$0xff] }
  0xa7   : > { %v1734_v52 = vpop.permute.xlu2 %782 }
  0xa8   : > { %v568_v53 = vmul.f32 -0.5, %v536_v51  ;;  %v1736_v54 = vpop.permute.xlu1 %732  ;;  %v1738_v55 = vpop.permute.xlu0 %727 }
  0xaa   : > { %v616_v63 = vmul.f32 1.442695, %v568_v53  ;;  %v901_v53 = vld [vmem:[%s1671_s7 + $0xe8] sm:$0xff] }
  0xab   : > { %v475_v57 = vpop.f32.mrf.mxu2  ;;  %v499_v58 = vpop.f32.mrf.mxu3 }
  0xac   : > { %v1338_v61 = vpop.eup %1337  ;;  %v476_v0 = vadd.f32 %v1712_v30, %v475_v57  ;;  %v1745_v1 = vpop.f32.mrf.mxu0  ;;  %1339 = vpow2.f32 %v616_v63  ;;  %v500_v32 = vadd.f32 %v1712_v30, %v499_v58 }
  0xad   : > { %v1747_v2 = vpop.f32.mrf.mxu1  ;;  %1026 = vperm.xlu2 %1335, %v896_v56   ;;  %v1750_v3 = vmul.f32 %v1338_v61, %v1689_v17  ;;  %v897_v17 = vld [vmem:[%s1671_s7 + $0xc8] sm:$0xff]  ;;  %v900_v56 = vld [vmem:[%s1671_s7 + $0xe0] sm:$0xff] }
  0xae   : > { %v537_v4 = vmul.f32 %v476_v0, %v476_v0  ;;  %1021 = vperm.xlu1 %1334, %v895_v59   ;;  %1016 = vperm.xlu0 %1333, %v894_v60   ;;  %v545_v47 = vmul.f32 %v500_v32, %v500_v32 }
  0xaf   : > { %v1752_v5 = vpop.permute.xlu2 %797 }
  0xb0   : > { %v569_v7 = vmul.f32 -0.5, %v537_v4  ;;  %v1754_v8 = vpop.permute.xlu1 %747  ;;  %v1756_v10 = vpop.permute.xlu0 %742  ;;  %v577_v63 = vmul.f32 -0.5, %v545_v47 }
  0xb2   : > { %v618_v11 = vmul.f32 1.442695, %v569_v7  ;;  %v1340_v26 = vpop.eup %1339 }
  0xb3   : > { %v1759_v14 = vpop.f32.mrf.mxu2  ;;  %v502_v15 = vpop.f32.mrf.mxu3 }
  0xb4   : > { %1341 = vpow2.f32 %v618_v11  ;;  %v503_v19 = vadd.f32 %v1712_v30, %v502_v15  ;;  %v433_v20 = vpop.f32.mrf.mxu0 }
  0xb5   : > { %v1764_v24 = vpop.f32.mrf.mxu1  ;;  %v434_v25 = vadd.f32 %v1712_v30, %v433_v20  ;;  %1041 = vperm.xlu2 %1335, %v899_v12   ;;  %1343 = vpow2.f32 %v584_v34  ;;  %v452_v12 = vadd.f32 %v1712_v30, %v1732_v50  ;;  %v903_v20 = vld [vmem:[%s1671_s7 + $0xf8] sm:$0xff]  ;;  %s1421_s7 = scalar_lea.hbm %s1976_s5, 512 }
  0xb6   : > { %v546_v31 = vmul.f32 %v503_v19, %v503_v19  ;;  %1036 = vperm.xlu1 %1334, %v898_v16   ;;  %1031 = vperm.xlu0 %1333, %v897_v17   ;;  %v634_v17 = vmul.f32 1.442695, %v577_v63  ;;  %p1423_p1 = scmp.lt.s32.totalorder %s1421_s7, %s1417_s26 }
  0xb7   : > { %v813_v33 = vpop.permute.xlu2 %812  ;;  %v523_v41 = vmul.f32 %v434_v25, %v434_v25 }
  0xb8   : > { %v578_v35 = vmul.f32 -0.5, %v546_v31  ;;  %v763_v36 = vpop.permute.xlu1 %762  ;;  %v1768_v37 = vpop.permute.xlu0 %757  ;;  %p1424_p2 = por %p1423_p1, %p1422_p0 }
  0xb9   : > { %v1770_v42 = vmul.f32 %v1340_v26, %v763_v36  ;;  %v555_v61 = vmul.f32 -0.5, %v523_v41 }
  0xba   : > { %v1342_v43 = vpop.eup %1341  ;;  %v636_v44 = vmul.f32 1.442695, %v578_v35  ;;  %v529_v35 = vmul.f32 %v452_v12, %v452_v12  ;;  %p1425_p3 = pnand %p1424_p2, %p1420_p13 }
  0xbb   : > { %v481_v48 = vpop.f32.mrf.mxu2  ;;  %v1773_v51 = vpop.f32.mrf.mxu3  ;;  %v1778_v57 = vmul.f32 %v1342_v43, %v1718_v38  ;;  %v590_v7 = vmul.f32 1.442695, %v555_v61 }
  0xbc   : > { %v482_v58 = vadd.f32 %v1712_v30, %v481_v48  ;;  %v1781_v59 = vpop.f32.mrf.mxu0  ;;  %1345 = vpow2.f32 %v636_v44  ;;  %v1344_v11 = vpop.eup %1343  ;;  %v561_v63 = vmul.f32 -0.5, %v529_v35 }
  0xbd   : > { %v460_v60 = vpop.f32.mrf.mxu1  ;;  %1056 = vperm.xlu2 %1335, %v902_v46  }
  0xbe   : > { %v539_v62 = vmul.f32 %v482_v58, %v482_v58  ;;  %1051 = vperm.xlu1 %1334, %v901_v53   ;;  %1046 = vperm.xlu0 %1333, %v900_v56  }
  0xbf   : > { %v1783_v0 = vpop.permute.xlu2 %827 }
  0xc0   : > { %v571_v4 = vmul.f32 -0.5, %v539_v62  ;;  %v778_v38 = vpop.permute.xlu1 %777  ;;  %v1785_v6 = vpop.permute.xlu0 %772  ;;  %v428_v62 = vadd.f32 %v1712_v30, %v1730_v49 }
  0xc2   : > { %v622_v15 = vmul.f32 1.442695, %v571_v4  ;;  %v1346_v16 = vpop.eup %1345 }
  0xc3   : > { %v484_v18 = vpop.f32.mrf.mxu2  ;;  %v508_v19 = vpop.f32.mrf.mxu3  ;;  %v1791_v25 = vmul.f32 %v1346_v16, %v813_v33  ;;  %v840_v33 = vmul.f32 %v1344_v11, %v1698_v23 }
  0xc4   : > { %1347 = vpow2.f32 %v622_v15  ;;  %v485_v26 = vadd.f32 %v1712_v30, %v484_v18  ;;  %v509_v31 = vadd.f32 %v1712_v30, %v508_v19  ;;  %v1795_v32 = vpop.f32.mrf.mxu0 }
  0xc5   : > { %v463_v34 = vpop.f32.mrf.mxu1  ;;  %1349 = vpow2.f32 %v590_v7  ;;  %v431_v7 = vadd.f32 %v1712_v30, %v1745_v1  ;;  %v521_v1 = vmul.f32 %v428_v62, %v428_v62 }
  0xc6   : > { %v464_v50 = vadd.f32 %v1712_v30, %v463_v34  ;;  %v540_v36 = vmul.f32 %v485_v26, %v485_v26  ;;  %v548_v41 = vmul.f32 %v509_v31, %v509_v31  ;;  %1061 = vperm.xlu0 %1333, %v903_v20   ;;  %1351 = vpow2.f32 %v634_v17 }
  0xc7   : > { %v907_v44 = vpop.permute.xlu2 %906  ;;  %v461_v20 = vadd.f32 %v1712_v30, %v460_v60 }
  0xc8   : > { %v533_v43 = vmul.f32 %v464_v50, %v464_v50  ;;  %v572_v46 = vmul.f32 -0.5, %v540_v36  ;;  %v580_v47 = vmul.f32 -0.5, %v548_v41  ;;  %v1064_v48 = vadd.f32 %v907_v44, %v840_v33  ;;  %v1801_v53 = vpop.permute.xlu1 %792  ;;  %v1803_v56 = vpop.permute.xlu0 %787 }
  0xc9   : > { %v522_v36 = vmul.f32 %v431_v7, %v431_v7  ;;  %v437_v44 = vadd.f32 %v1712_v30, %v1781_v59 }
  0xca   : > { %v565_v58 = vmul.f32 -0.5, %v533_v43  ;;  %v1348_v61 = vpop.eup %1347  ;;  %v624_v4 = vmul.f32 1.442695, %v572_v46  ;;  %1096 = vst [vmem:[%s1807_s12] sm:$0xff] %v1064_v48  ;;  %v640_v17 = vmul.f32 1.442695, %v580_v47 }
  0xcb   : > { %v1350_v23 = vpop.eup %1349  ;;  %v1812_v11 = vmul.f32 %v1348_v61, %v778_v38  ;;  %v1814_v15 = vpop.f32.mrf.mxu2  ;;  %v602_v38 = vmul.f32 1.442695, %v561_v63  ;;  %v554_v7 = vmul.f32 -0.5, %v522_v36 }
  0xcc   : > { %v610_v12 = vmul.f32 1.442695, %v565_v58  ;;  %v511_v16 = vpop.f32.mrf.mxu3  ;;  %1353 = vpow2.f32 %v624_v4  ;;  %v442_v18 = vpop.f32.mrf.mxu0  ;;  %v843_v35 = vmul.f32 %v1350_v23, %v1705_v28  ;;  %v532_v58 = vmul.f32 %v461_v20, %v461_v20 }
  0xcd   : > { %v512_v49 = vadd.f32 %v1712_v30, %v511_v16  ;;  %v466_v19 = vpop.f32.mrf.mxu1  ;;  %v443_v26 = vadd.f32 %v1712_v30, %v442_v18  ;;  %v1352_v34 = vpop.eup %1351  ;;  %v553_v4 = vmul.f32 -0.5, %v521_v1  ;;  %v524_v18 = vmul.f32 %v437_v44, %v437_v44 }
  0xce   : > { %v467_v31 = vadd.f32 %v1712_v30, %v466_v19  ;;  %1355 = vpow2.f32 %v610_v12 }
  0xcf   : > { %v549_v50 = vmul.f32 %v512_v49, %v512_v49  ;;  %v526_v41 = vmul.f32 %v443_v26, %v443_v26  ;;  %v922_v43 = vpop.permute.xlu2 %921  ;;  %1357 = vpow2.f32 %v640_v17 }
  0xd0   : > { %v534_v33 = vmul.f32 %v467_v31, %v467_v31  ;;  %v1067_v46 = vadd.f32 %v922_v43, %v843_v35  ;;  %v808_v47 = vpop.permute.xlu1 %807  ;;  %v1823_v48 = vpop.permute.xlu0 %802  ;;  %1359 = vpow2.f32 %v602_v38  ;;  %v564_v31 = vmul.f32 -0.5, %v532_v58 }
  0xd1   : > { %v581_v60 = vmul.f32 -0.5, %v549_v50  ;;  %v558_v61 = vmul.f32 -0.5, %v526_v41  ;;  %v1825_v63 = vmul.f32 %v1352_v34, %v808_v47  ;;  %v440_v34 = vadd.f32 %v1712_v30, %v1795_v32 }
  0xd2   : > { %v566_v62 = vmul.f32 -0.5, %v534_v33  ;;  %v1354_v28 = vpop.eup %1353  ;;  %1099 = vst [vmem:[%s1807_s12 + $0x18] sm:$0xff] %v1067_v46  ;;  %v586_v50 = vmul.f32 1.442695, %v553_v4  ;;  %v556_v32 = vmul.f32 -0.5, %v524_v18 }
  0xd3   : > { %v642_v23 = vmul.f32 1.442695, %v581_v60  ;;  %v596_v12 = vmul.f32 1.442695, %v558_v61  ;;  %v490_v59 = vpop.f32.mrf.mxu2  ;;  %v1831_v49 = vmul.f32 %v1354_v28, %v1734_v52  ;;  %v588_v52 = vmul.f32 1.442695, %v554_v7 }
  0xd4   : > { %v612_v16 = vmul.f32 1.442695, %v566_v62  ;;  %v1828_v17 = vpop.f32.mrf.mxu3  ;;  %v491_v19 = vadd.f32 %v1712_v30, %v490_v59  ;;  %v1356_v26 = vpop.eup %1355  ;;  %v608_v47 = vmul.f32 1.442695, %v564_v31  ;;  %v525_v58 = vmul.f32 %v440_v34, %v440_v34 }
  0xd5   : > { %v469_v20 = vpop.f32.mrf.mxu1  ;;  %1361 = vpow2.f32 %v642_v23  ;;  %v1358_v38 = vpop.eup %1357  ;;  %v1838_v36 = vmul.f32 %v1356_v26, %v1754_v8  ;;  %v479_v23 = vadd.f32 %v1712_v30, %v1759_v14  ;;  %v592_v31 = vmul.f32 1.442695, %v556_v32 }
  0xd6   : > { %v470_v1 = vadd.f32 %v1712_v30, %v469_v20  ;;  %1363 = vpow2.f32 %v596_v12  ;;  %v542_v35 = vmul.f32 %v491_v19, %v491_v19  ;;  %v1360_v43 = vpop.eup %1359  ;;  %v445_v28 = vpop.f32.mrf.mxu0 }
  0xd7   : > { %1365 = vpow2.f32 %v612_v16  ;;  %v937_v33 = vpop.permute.xlu2 %936  ;;  %v849_v8 = vmul.f32 %v1360_v43, %v1738_v55  ;;  %v557_v55 = vmul.f32 -0.5, %v525_v58  ;;  %v446_v14 = vadd.f32 %v1712_v30, %v445_v28 }
  0xd8   : > { %v535_v41 = vmul.f32 %v470_v1, %v470_v1  ;;  %v574_v44 = vmul.f32 -0.5, %v542_v35  ;;  %v823_v60 = vpop.permute.xlu1 %822  ;;  %v1840_v46 = vpop.permute.xlu0 %817  ;;  %1367 = vpow2.f32 %v586_v50  ;;  %v538_v58 = vmul.f32 %v479_v23, %v479_v23 }
  0xd9   : > { %v1842_v61 = vmul.f32 %v1358_v38, %v823_v60  ;;  %1369 = vpow2.f32 %v588_v52  ;;  %v488_v23 = vadd.f32 %v1712_v30, %v1814_v15 }
  0xda   : > { %v628_v62 = vmul.f32 1.442695, %v574_v44  ;;  %v567_v7 = vmul.f32 -0.5, %v535_v41 }
  0xdb   : > { %v1362_v4 = vpop.eup %1361  ;;  %v493_v12 = vpop.f32.mrf.mxu2 }
  0xdc   : > { %v517_v16 = vpop.f32.mrf.mxu3  ;;  %v1364_v59 = vpop.eup %1363  ;;  %1371 = vpow2.f32 %v628_v62  ;;  %v494_v18 = vadd.f32 %v1712_v30, %v493_v12  ;;  %v1850_v20 = vmul.f32 %v1362_v4, %v1783_v0  ;;  %v614_v35 = vmul.f32 1.442695, %v567_v7 }
  0xdd   : > { %v518_v19 = vadd.f32 %v1712_v30, %v517_v16  ;;  %v1366_v26 = vpop.eup %1365  ;;  %1373 = vpow2.f32 %v608_v47  ;;  %v846_v34 = vmul.f32 %v1364_v59, %v1722_v40  ;;  %v594_v62 = vmul.f32 1.442695, %v557_v55 }
  0xde   : > { %v543_v1 = vmul.f32 %v494_v18, %v494_v18  ;;  %v1855_v50 = vmul.f32 %v1366_v26, %v1703_v27  ;;  %v1368_v0 = vpop.eup %1367  ;;  %1375 = vpow2.f32 %v592_v31  ;;  %v527_v4 = vmul.f32 %v446_v14, %v446_v14 }
  0xdf   : > { %v551_v38 = vmul.f32 %v518_v19, %v518_v19  ;;  %v1070_v52 = vadd.f32 %v937_v33, %v846_v34  ;;  %v952_v41 = vpop.permute.xlu2 %951  ;;  %v1370_v40 = vpop.eup %1369  ;;  %1377 = vpow2.f32 %v614_v35  ;;  %v570_v16 = vmul.f32 -0.5, %v538_v58 }
  0xe0   : > { %v575_v43 = vmul.f32 -0.5, %v543_v1  ;;  %v1073_v60 = vadd.f32 %v952_v41, %v849_v8  ;;  %v838_v32 = vpop.permute.xlu1 %837  ;;  %v1857_v47 = vpop.permute.xlu0 %832  ;;  %v455_v8 = vadd.f32 %v1712_v30, %v1747_v2  ;;  %v458_v59 = vadd.f32 %v1712_v30, %v1764_v24 }
  0xe1   : > { %v583_v44 = vmul.f32 -0.5, %v551_v38  ;;  %1102 = vst [vmem:[%s1807_s12 + $0x30] sm:$0xff] %v1070_v52  ;;  %v559_v18 = vmul.f32 -0.5, %v527_v4  ;;  %v841_v31 = vmul.f32 %v1368_v0, %v1707_v29  ;;  %v620_v38 = vmul.f32 1.442695, %v570_v16 }
  0xe2   : > { %v1372_v28 = vpop.eup %1371  ;;  %v630_v27 = vmul.f32 1.442695, %v575_v43  ;;  %1105 = vst [vmem:[%s1807_s12 + $0x48] sm:$0xff] %v1073_v60  ;;  %v530_v55 = vmul.f32 %v455_v8, %v455_v8  ;;  %v541_v24 = vmul.f32 %v488_v23, %v488_v23 }
  0xe3   : > { %v646_v12 = vmul.f32 1.442695, %v583_v44  ;;  %v1374_v33 = vpop.eup %1373  ;;  %v1862_v7 = vmul.f32 %v1372_v28, %v1801_v53  ;;  %v842_v53 = vmul.f32 %v1370_v40, %v1696_v22  ;;  %v598_v43 = vmul.f32 1.442695, %v559_v18 }
  0xe4   : > { %1379 = vpow2.f32 %v630_v27  ;;  %v852_v19 = vmul.f32 %v1374_v33, %v1756_v10  ;;  %v1376_v2 = vpop.eup %1375  ;;  %v531_v10 = vmul.f32 %v458_v59, %v458_v59  ;;  %v562_v0 = vmul.f32 -0.5, %v530_v55 }
  0xe5   : > { %1381 = vpow2.f32 %v646_v12  ;;  %v1378_v1 = vpop.eup %1377  ;;  %v497_v40 = vadd.f32 %v1712_v30, %v1725_v45  ;;  %v573_v58 = vmul.f32 -0.5, %v541_v24  ;;  %v844_v27 = vmul.f32 %v1376_v2, %v1679_v9 }
  0xe6   : > { %1383 = vpow2.f32 %v594_v62  ;;  %v563_v62 = vmul.f32 -0.5, %v531_v10  ;;  %v855_v28 = vmul.f32 %v1378_v1, %v1768_v37  ;;  %v506_v9 = vadd.f32 %v1712_v30, %v1773_v51 }
  0xe7   : > { %v967_v26 = vpop.permute.xlu2 %966  ;;  %1385 = vpow2.f32 %v620_v38  ;;  %v544_v16 = vmul.f32 %v497_v40, %v497_v40  ;;  %v626_v45 = vmul.f32 1.442695, %v573_v58 }
  0xe8   : > { %v1076_v34 = vadd.f32 %v967_v26, %v852_v19  ;;  %v917_v14 = vpop.permute.xlu1 %916  ;;  %v912_v15 = vpop.permute.xlu0 %911  ;;  %1387 = vpow2.f32 %v598_v43  ;;  %v606_v18 = vmul.f32 1.442695, %v563_v62 }
  0xe9   : > { %v1066_v35 = vadd.f32 %v917_v14, %v842_v53  ;;  %v1065_v52 = vadd.f32 %v912_v15, %v841_v31  ;;  %v547_v15 = vmul.f32 %v506_v9, %v506_v9 }
  0xea   : > { %v1380_v41 = vpop.eup %1379  ;;  %1108 = vst [vmem:[%s1807_s12 + $0x60] sm:$0xff] %v1076_v34 }
  0xeb   : > { %v1382_v44 = vpop.eup %1381  ;;  %1098 = vst [vmem:[%s1807_s12 + $0x10] sm:$0xff] %v1066_v35  ;;  %v1876_v22 = vmul.f32 %v1380_v41, %v1752_v5 }
  0xec   : > { %v1384_v29 = vpop.eup %1383  ;;  %v1878_v60 = vmul.f32 %v1382_v44, %v838_v32  ;;  %1097 = vst [vmem:[%s1807_s12 + $0x8] sm:$0xff] %v1065_v52  ;;  %v604_v32 = vmul.f32 1.442695, %v562_v0 }
  0xed   : > { %v845_v5 = vmul.f32 %v1384_v29, %v1684_v13  ;;  %v1386_v19 = vpop.eup %1385  ;;  %v576_v13 = vmul.f32 -0.5, %v544_v16 }
  0xee   : > { %v1388_v26 = vpop.eup %1387  ;;  %1389 = vpow2.f32 %v604_v32  ;;  %v858_v37 = vmul.f32 %v1386_v19, %v1785_v6  ;;  %v579_v6 = vmul.f32 -0.5, %v547_v15 }
  0xef   : > { %v982_v4 = vpop.permute.xlu2 %981  ;;  %1391 = vpow2.f32 %v626_v45  ;;  %v847_v31 = vmul.f32 %v1388_v26, %v1720_v39  ;;  %v632_v14 = vmul.f32 1.442695, %v576_v13  ;;  %v515_v39 = vadd.f32 %v1712_v30, %v1828_v17 }
  0xf0   : > { %v1079_v12 = vadd.f32 %v982_v4, %v855_v28  ;;  %v932_v33 = vpop.permute.xlu1 %931  ;;  %v927_v8 = vpop.permute.xlu0 %926  ;;  %1393 = vpow2.f32 %v606_v18  ;;  %v638_v0 = vmul.f32 1.442695, %v579_v6 }
  0xf1   : > { %v1069_v23 = vadd.f32 %v932_v33, %v845_v5  ;;  %v1068_v59 = vadd.f32 %v927_v8, %v844_v27  ;;  %1395 = vpow2.f32 %v632_v14  ;;  %v550_v40 = vmul.f32 %v515_v39, %v515_v39 }
  0xf2   : > { %1111 = vst [vmem:[%s1807_s12 + $0x78] sm:$0xff] %v1079_v12  ;;  %1397 = vpow2.f32 %v638_v0 }
  0xf3   : > { %1101 = vst [vmem:[%s1807_s12 + $0x28] sm:$0xff] %v1069_v23  ;;  %v582_v30 = vmul.f32 -0.5, %v550_v40 }
  0xf4   : > { %1100 = vst [vmem:[%s1807_s12 + $0x20] sm:$0xff] %v1068_v59  ;;  %v1390_v24 = vpop.eup %1389 }
  0xf5   : > { %v1392_v51 = vpop.eup %1391  ;;  %v850_v10 = vmul.f32 %v1390_v24, %v1736_v54  ;;  %v644_v5 = vmul.f32 1.442695, %v582_v30 }
  0xf6   : > { %v1394_v35 = vpop.eup %1393  ;;  %v861_v52 = vmul.f32 %v1392_v51, %v1803_v56 }
  0xf7   : > { %v997_v53 = vpop.permute.xlu2 %996  ;;  %v1396_v28 = vpop.eup %1395  ;;  %1399 = vpow2.f32 %v644_v5 }
  0xf8   : > { %v1082_v2 = vadd.f32 %v997_v53, %v858_v37  ;;  %v947_v55 = vpop.permute.xlu1 %946  ;;  %v942_v34 = vpop.permute.xlu0 %941 }
  0xf9   : > { %v1072_v1 = vadd.f32 %v947_v55, %v1750_v3  ;;  %v1071_v38 = vadd.f32 %v942_v34, %v847_v31  ;;  %v851_v3 = vmul.f32 %v1394_v35, %v1694_v21  ;;  %v864_v21 = vmul.f32 %v1396_v28, %v1823_v48  ;;  %v1398_v12 = vpop.eup %1397 }
  0xfa   : > { %1114 = vst [vmem:[%s1807_s12 + $0x90] sm:$0xff] %v1082_v2  ;;  %v867_v33 = vmul.f32 %v1398_v12, %v1840_v46 }
  0xfb   : > { %1104 = vst [vmem:[%s1807_s12 + $0x40] sm:$0xff] %v1072_v1 }
  0xfc   : > { %1103 = vst [vmem:[%s1807_s12 + $0x38] sm:$0xff] %v1071_v38 }
  0xff   : > { %v1012_v41 = vpop.permute.xlu2 %1011 }
 0x100   : > { %v1085_v43 = vadd.f32 %v1012_v41, %v861_v52  ;;  %v962_v44 = vpop.permute.xlu1 %961  ;;  %v957_v29 = vpop.permute.xlu0 %956 }
 0x101   : > { %v1075_v58 = vadd.f32 %v962_v44, %v851_v3  ;;  %v1074_v62 = vadd.f32 %v957_v29, %v850_v10 }
 0x102   : > { %1117 = vst [vmem:[%s1807_s12 + $0xa8] sm:$0xff] %v1085_v43 }
 0x103   : > { %1107 = vst [vmem:[%s1807_s12 + $0x58] sm:$0xff] %v1075_v58 }
 0x104   : > { %1106 = vst [vmem:[%s1807_s12 + $0x50] sm:$0xff] %v1074_v62 }
 0x107   : > { %v1027_v56 = vpop.permute.xlu2 %1026 }
 0x108   : > { %v1088_v54 = vadd.f32 %v1027_v56, %v864_v21  ;;  %v977_v17 = vpop.permute.xlu1 %976  ;;  %v972_v4 = vpop.permute.xlu0 %971 }
 0x109   : > { %v1078_v27 = vadd.f32 %v977_v17, %v1855_v50  ;;  %v1077_v32 = vadd.f32 %v972_v4, %v1838_v36  ;;  %v1400_v36 = vpop.eup %1399 }
 0x10a   : > { %1120 = vst [vmem:[%s1807_s12 + $0xc0] sm:$0xff] %v1088_v54  ;;  %v870_v59 = vmul.f32 %v1400_v36, %v1857_v47 }
 0x10b   : > { %1110 = vst [vmem:[%s1807_s12 + $0x70] sm:$0xff] %v1078_v27 }
 0x10c   : > { %1109 = vst [vmem:[%s1807_s12 + $0x68] sm:$0xff] %v1077_v32 }
 0x10f   : > { %v1042_v48 = vpop.permute.xlu2 %1041 }
 0x110   : > { %v1091_v8 = vadd.f32 %v1042_v48, %v867_v33  ;;  %v992_v16 = vpop.permute.xlu1 %991  ;;  %v987_v45 = vpop.permute.xlu0 %986 }
 0x111   : > { %v1081_v50 = vadd.f32 %v992_v16, %v1778_v57  ;;  %v1080_v23 = vadd.f32 %v987_v45, %v1770_v42 }
 0x112   : > { %1123 = vst [vmem:[%s1807_s12 + $0xd8] sm:$0xff] %v1091_v8 }
 0x113   : > { %1113 = vst [vmem:[%s1807_s12 + $0x88] sm:$0xff] %v1081_v50 }
 0x114   : > { %1112 = vst [vmem:[%s1807_s12 + $0x80] sm:$0xff] %v1080_v23 }
 0x117   : > { %v1057_v46 = vpop.permute.xlu2 %1056 }
 0x118   : > { %v1094_v18 = vadd.f32 %v1057_v46, %v870_v59  ;;  %v1007_v19 = vpop.permute.xlu1 %1006  ;;  %v1002_v26 = vpop.permute.xlu0 %1001 }
 0x119   : > { %v1084_v13 = vadd.f32 %v1007_v19, %v1831_v49  ;;  %v1083_v57 = vadd.f32 %v1002_v26, %v1812_v11 }
 0x11a   : > { %1126 = vst [vmem:[%s1807_s12 + $0xf0] sm:$0xff] %v1094_v18 }
 0x11b   : > { %1116 = vst [vmem:[%s1807_s12 + $0xa0] sm:$0xff] %v1084_v13 }
 0x11c   : > { %1115 = vst [vmem:[%s1807_s12 + $0x98] sm:$0xff] %v1083_v57 }
 0x120   : > { %v1022_v42 = vpop.permute.xlu1 %1021  ;;  %v1017_v9 = vpop.permute.xlu0 %1016 }
 0x121   : > { %v1087_v37 = vadd.f32 %v1022_v42, %v1876_v22  ;;  %v1086_v47 = vadd.f32 %v1017_v9, %v1862_v7 }
 0x123   : > { %1119 = vst [vmem:[%s1807_s12 + $0xb8] sm:$0xff] %v1087_v37 }
 0x124   : > { %1118 = vst [vmem:[%s1807_s12 + $0xb0] sm:$0xff] %v1086_v47 }
 0x128   : > { %v1037_v53 = vpop.permute.xlu1 %1036  ;;  %v1032_v49 = vpop.permute.xlu0 %1031 }
 0x129   : > { %v1090_v31 = vadd.f32 %v1037_v53, %v1791_v25  ;;  %v1089_v11 = vadd.f32 %v1032_v49, %v1825_v63 }
 0x12b   : > { %1122 = vst [vmem:[%s1807_s12 + $0xd0] sm:$0xff] %v1090_v31 }
 0x12c   : > { %1121 = vst [vmem:[%s1807_s12 + $0xc8] sm:$0xff] %v1089_v11 }
 0x130   : > { %v1052_v2 = vpop.permute.xlu1 %1051  ;;  %v1047_v22 = vpop.permute.xlu0 %1046 }
 0x131   : > { %v1093_v55 = vadd.f32 %v1052_v2, %v1850_v20  ;;  %v1092_v7 = vadd.f32 %v1047_v22, %v1842_v61 }
 0x133   : > { %1125 = vst [vmem:[%s1807_s12 + $0xe8] sm:$0xff] %v1093_v55 }
 0x134   : > { %1124 = vst [vmem:[%s1807_s12 + $0xe0] sm:$0xff] %v1092_v7 }
 0x138   : > { %v1062_v25 = vpop.permute.xlu0 %1061 }
 0x139   : > { %v1095_v63 = vadd.f32 %v1062_v25, %v1878_v60 }
 0x13b   : > { %1127 = vst [vmem:[%s1807_s12 + $0xf8] sm:$0xff] %v1095_v63 }
 0x13c   : > { %1428 = shalt.err (!%p1425_p3)
}
 0x13d   : > { %s1466_s10 = smov 128   ;;  %s1467_s11 = smov 8  }
 0x13e   : > { %1291 = dma.vmem_to_hbm [thread:$0]  (%p1536_p5), %s1142_s17, 4096, %s1144_s23, %s1129_s22, %s1466_s10, %s1466_s10, %s1467_s11  }
 0x13f PF: > { %p1297_p4 = scmp.ge.s32.totalorder %s1463_s21, 2  ;;  %s1158_s12 = sand.u32 1, %s1451_s18  }
 0x140   : > { %s1159_s13 = scalar_lea.sflag [#allocation3], %s1158_s12 }
 0x141   : > { %p1294_p7 = pnand %p1297_p4, %p1540_p6 }
 0x143   : > { %p1295_p8 = pneg %p1294_p7 }
 0x145   : > { %1446 = dma.done.wait (%p1295_p8), %s1159_s13, 4096  }
 0x146   : > { %1448 = vsyncadd (%p1295_p8), %s1159_s13, 4294963200  ;;  %p15_p9 = scmp.ge.s32.totalorder %s1523_s24, 4   ;;  %s1979_s18 = smov %s1455_s19 }
 0x147   : > { %s1980_s19 = smov %s1459_s20  ;;  %s1981_s20 = smov %s1534_s27 }
 0x148   : > { %s1982_s21 = smov %s1523_s24  ;;  %17 = sbr.rel (!%p15_p9) target bundleno = 3 (0x3), region = 81 }
 0x14d   :  { %1165 = vsyncpa [#allocation3], 1 }
 0x14e   :  { %1167 = vsyncpa [#allocation3 + $0x1], 1 }

</bundles_post_ra>
